<compile_context>
chip_gen: v7x
topology: tpu7x:2x2x1
jax: 0.10.0
libtpu: 0.0.40
codegen_flags: <defaults>
</compile_context>

<pallas_src>
import jax
import jax.numpy as jnp
from jax.experimental import pallas as pl
from jax.experimental.pallas import tpu as pltpu

EPS = 1e-7
L1 = 1.0
LANE = 128
# Fixed class weights from MLFCWLoss.__init__ (C = 9).
FIXED_CLASS_WEIGHT = (0.01, 0.9, 0.08, 1.0, 0.5, 1.0, 0.1, 0.9, 1.2)


def _round_up(x, m):
    return ((x + m - 1) // m) * m


def _mlfcw_kernel(pred_ref, target_ref, mask_ref, out_ref, acc_ref):
    t_idx = pl.program_id(1)

    @pl.when(t_idx == 0)
    def _():
        acc_ref[...] = jnp.zeros_like(acc_ref)

    x = pred_ref[0]                            # (C, R, 128) f32 logits
    t = target_ref[0].astype(jnp.float32)      # (C, R, 128) binary
    m = mask_ref[0].astype(jnp.float32)        # (R, 128)   binary
    m3 = m[None, :, :]                         # broadcast over classes

    # Single exp per element: e = exp(-|x|) gives both sigmoid and softplus.
    e = jnp.exp(-jnp.abs(x))
    inv = pl.reciprocal(1.0 + e, approx=True)          # EUP, nearly free
    p = jnp.where(x >= 0, 1.0, e) * inv                 # sigmoid(x), stable
    # binary_cross_entropy_with_logits: max(x,0) - x*t + log1p(exp(-|x|))
    bce = jnp.maximum(x, 0.0) - x * t + jnp.log1p(e)

    # fcw_pixel = (1 + sigmoid + target) * class_w ; class_w applied in wrapper
    w_bce = (1.0 + p + t) * (m3 * bce)
    pm = p * m3
    tm = t * m3

    # Sublane-only reductions -> per-class, lane-dense partials.
    acc_ref[0] += jnp.sum(w_bce, axis=1)       # (C, 128)
    acc_ref[1] += jnp.sum(pm * tm, axis=1)     # intersection
    acc_ref[2] += jnp.sum(pm, axis=1)
    acc_ref[3] += jnp.sum(tm, axis=1)

    @pl.when(t_idx == pl.num_programs(1) - 1)
    def _():
        out_ref[0] = acc_ref[...]


def mlfcw_loss(pred_nchw, target_nchw, mask_nhw, l1=L1, max_tile_rows=512):
    B, C, H, W = pred_nchw.shape
    HW = H * W

    # ---- host-side repack: HW -> (rows, 128), zero-padded (mask=0 kills pad) ----
    rows = pl.cdiv(HW, LANE)
    rows_pad = _round_up(rows, 8) if rows > 8 else rows
    R = min(max_tile_rows, rows_pad)           # tile rows; R*128 spatial elems/step
    rows_pad = _round_up(rows_pad, R)
    HW_pad = rows_pad * LANE
    num_tiles = rows_pad // R

    pred = pred_nchw.reshape(B, C, HW).astype(jnp.float32)
    # target/mask are binary -> bf16 cast is exact and halves their HBM traffic.
    target = target_nchw.reshape(B, C, HW).astype(jnp.bfloat16)
    mask = mask_nhw.reshape(B, HW).astype(jnp.bfloat16)
    if HW_pad != HW:
        pad = HW_pad - HW
        pred = jnp.pad(pred, ((0, 0), (0, 0), (0, pad)))
        target = jnp.pad(target, ((0, 0), (0, 0), (0, pad)))
        mask = jnp.pad(mask, ((0, 0), (0, pad)))          # pad mask with 0
    pred = pred.reshape(B, C, rows_pad, LANE)
    target = target.reshape(B, C, rows_pad, LANE)
    mask = mask.reshape(B, rows_pad, LANE)

    partials = pl.pallas_call(
        _mlfcw_kernel,
        out_shape=jax.ShapeDtypeStruct((B, 4, C, LANE), jnp.float32),
        grid_spec=pltpu.PrefetchScalarGridSpec(
            num_scalar_prefetch=0,
            grid=(B, num_tiles),
            in_specs=[
                # If profiling shows exposed DMA, add pipeline_mode=pl.Buffered(3)
                # to pred/target specs (keep 2 on v7x if VMEM gets tight).
                pl.BlockSpec((1, C, R, LANE), lambda b, t: (b, 0, t, 0)),
                pl.BlockSpec((1, C, R, LANE), lambda b, t: (b, 0, t, 0)),
                pl.BlockSpec((1, R, LANE), lambda b, t: (b, t, 0)),
            ],
            out_specs=pl.BlockSpec((1, 4, C, LANE), lambda b, t: (b, 0, 0, 0)),
            scratch_shapes=[pltpu.VMEM((4, C, LANE), jnp.float32)],
        ),
        compiler_params=pltpu.CompilerParams(
            dimension_semantics=("parallel", "arbitrary"),
            vmem_limit_bytes=32 * 1024 * 1024,
        ),
    )(pred, target, mask)

    # ---- tiny finalisation in plain JAX ----
    cw = jnp.asarray(FIXED_CLASS_WEIGHT, dtype=jnp.float32)       # (C,)
    sums = jnp.sum(partials, axis=(0, 3))                         # (4, C)

    # torch.sum(loss_bce, dim=1).mean() == sum(cw_c * per-class sum) / (B*H*W)
    bce_term = jnp.sum(cw * sums[0]) / (B * H * W)

    # TODO(synk): CustomiseJaccardLoss source not provided; using the standard
    # masked soft-Jaccard: 1 - (sum(p*t*m)+eps)/(sum(p*m)+sum(t*m)-sum(p*t*m)+eps).
    inter, psum, tsum = sums[1], sums[2], sums[3]
    union = psum + tsum - inter
    jcd = 1.0 - (inter + EPS) / (union + EPS)                      # (C,)
    jcd_term = jnp.mean(cw * jcd)

    return (bce_term + l1 * jcd_term) / (1.0 + l1)


def _reference_loss(pred, target, mask, l1=L1):
    """Pure-JAX reference mirroring the PyTorch forward."""
    cw = jnp.asarray(FIXED_CLASS_WEIGHT, dtype=jnp.float32)
    p = jax.nn.sigmoid(pred)
    bce = jnp.maximum(pred, 0.0) - pred * target + jnp.log1p(jnp.exp(-jnp.abs(pred)))
    bce = mask[:, None] * bce
    fcw_pixel = (1.0 + p + target) * cw[None, :, None, None]
    bce_term = jnp.mean(jnp.sum(fcw_pixel * bce, axis=1))
    pm = p * mask[:, None]
    tm = target * mask[:, None]
    inter = jnp.sum(pm * tm, axis=(0, 2, 3))
    union = jnp.sum(pm, axis=(0, 2, 3)) + jnp.sum(tm, axis=(0, 2, 3)) - inter
    jcd = 1.0 - (inter + EPS) / (union + EPS)
    jcd_term = jnp.mean(cw * jcd)
    return (bce_term + l1 * jcd_term) / (1.0 + l1)


if __name__ == "__main__":
    key = jax.random.PRNGKey(0)
    k1, k2, k3 = jax.random.split(key, 3)
    B, C, H, W = 2, 9, 16, 16
    pred = jax.random.normal(k1, (B, C, H, W), dtype=jnp.float32)
    target = (jax.random.uniform(k2, (B, C, H, W)) > 0.5).astype(jnp.float32)
    mask = (jax.random.uniform(k3, (B, H, W)) > 0.2).astype(jnp.float32)

    loss = jax.jit(mlfcw_loss)(pred, target, mask)
    jax.block_until_ready(loss)

    ref = _reference_loss(pred, target, mask)
    # Tolerance covers the approximate EUP reciprocal used for sigmoid.
    assert jnp.allclose(loss, ref, rtol=5e-3, atol=5e-3), (loss, ref)
    print("KERNEL_OK")
</pallas_src>

<mosaic_0001>
module attributes {stable_mosaic.version = 11 : i64} {
  func.func @_mlfcw_kernel(%arg0: i32, %arg1: i32, %arg2: memref<1x9x2x128xf32, #tpu.memory_space<vmem>>, %arg3: memref<1x9x2x128xbf16, #tpu.memory_space<vmem>>, %arg4: memref<1x2x128xbf16, #tpu.memory_space<vmem>>, %arg5: memref<1x4x9x128xf32, #tpu.memory_space<vmem>>, %arg6: memref<4x9x128xf32, #tpu.memory_space<vmem>>) attributes {dimension_semantics = [#tpu.dimension_semantics<parallel>, #tpu.dimension_semantics<arbitrary>], iteration_bounds = array<i64: 2, 1>, scalar_prefetch = 0 : i64, scratch_operands = 1 : i64, tpu.core_type = #tpu.core_type<tc>, window_params = [{transform_indices = @transform_0, window_bounds = array<i64: 1, 9, 2, 128>}, {transform_indices = @transform_1, window_bounds = array<i64: 1, 9, 2, 128>}, {transform_indices = @transform_2, window_bounds = array<i64: 1, 2, 128>}, {transform_indices = @transform_3, window_bounds = array<i64: 1, 4, 9, 128>}]} {
    %c0_i32 = arith.constant 0 : i32
    %0 = arith.cmpi eq, %arg1, %c0_i32 : i32
    %1 = arith.extui %0 : i1 to i32
    %c0_i32_0 = arith.constant 0 : i32
    %2 = arith.cmpi ne, %1, %c0_i32_0 : i32
    scf.if %2 {
      %cst_43 = arith.constant 0.000000e+00 : f32
      %72 = vector.broadcast %cst_43 : f32 to vector<4x9x128xf32>
      %c0_44 = arith.constant 0 : index
      %c0_45 = arith.constant 0 : index
      %c0_46 = arith.constant 0 : index
      %73 = vector.load %arg6[%c0_44, %c0_45, %c0_46] : memref<4x9x128xf32, #tpu.memory_space<vmem>>, vector<4x9x128xf32>
      tpu.vector_store %arg6[%c0_44, %c0_45, %c0_46], %72 {strides = array<i32>} : memref<4x9x128xf32, #tpu.memory_space<vmem>>, vector<4x9x128xf32>,
    } else {
    }
    %c0 = arith.constant 0 : index
    %c0_1 = arith.constant 0 : index
    %c0_2 = arith.constant 0 : index
    %c0_3 = arith.constant 0 : index
    %3 = vector.load %arg2[%c0, %c0_1, %c0_2, %c0_3] : memref<1x9x2x128xf32, #tpu.memory_space<vmem>>, vector<1x9x2x128xf32>
    %4 = vector.shape_cast %3 : vector<1x9x2x128xf32> to vector<9x2x128xf32>
    %c0_4 = arith.constant 0 : index
    %c0_5 = arith.constant 0 : index
    %c0_6 = arith.constant 0 : index
    %c0_7 = arith.constant 0 : index
    %5 = vector.load %arg3[%c0_4, %c0_5, %c0_6, %c0_7] : memref<1x9x2x128xbf16, #tpu.memory_space<vmem>>, vector<1x9x2x128xbf16>
    %6 = vector.shape_cast %5 : vector<1x9x2x128xbf16> to vector<9x2x128xbf16>
    %7 = arith.extf %6 : vector<9x2x128xbf16> to vector<9x2x128xf32>
    %c0_8 = arith.constant 0 : index
    %c0_9 = arith.constant 0 : index
    %c0_10 = arith.constant 0 : index
    %8 = vector.load %arg4[%c0_8, %c0_9, %c0_10] : memref<1x2x128xbf16, #tpu.memory_space<vmem>>, vector<1x2x128xbf16>
    %9 = vector.shape_cast %8 : vector<1x2x128xbf16> to vector<2x128xbf16>
    %10 = arith.extf %9 : vector<2x128xbf16> to vector<2x128xf32>
    %11 = vector.shape_cast %10 : vector<2x128xf32> to vector<1x2x128xf32>
    %12 = math.absf %4 : vector<9x2x128xf32>
    %cst = arith.constant 0.000000e+00 : f32
    %13 = vector.broadcast %cst : f32 to vector<9x2x128xf32>
    %14 = arith.subf %13, %12 : vector<9x2x128xf32>
    %15 = math.exp %14 : vector<9x2x128xf32>
    %cst_11 = arith.constant 1.000000e+00 : f32
    %16 = vector.broadcast %cst_11 : f32 to vector<9x2x128xf32>
    %17 = arith.addf %16, %15 : vector<9x2x128xf32>
    %18 = tpu.reciprocal %17 {approx = true} : vector<9x2x128xf32> -> vector<9x2x128xf32>
    %cst_12 = arith.constant 0.000000e+00 : f32
    %19 = vector.broadcast %cst_12 : f32 to vector<9x2x128xf32>
    %20 = arith.cmpf oge, %4, %19 : vector<9x2x128xf32>
    %cst_13 = arith.constant 1.000000e+00 : f32
    %21 = vector.broadcast %cst_13 : f32 to vector<9x2x128xf32>
    %22 = arith.select %20, %21, %15 : vector<9x2x128xi1>, vector<9x2x128xf32>
    %23 = arith.mulf %22, %18 : vector<9x2x128xf32>
    %cst_14 = arith.constant 0.000000e+00 : f32
    %24 = vector.broadcast %cst_14 : f32 to vector<9x2x128xf32>
    %25 = arith.maximumf %4, %24 : vector<9x2x128xf32>
    %26 = arith.mulf %4, %7 : vector<9x2x128xf32>
    %27 = arith.subf %25, %26 : vector<9x2x128xf32>
    %28 = math.log1p %15 : vector<9x2x128xf32>
    %29 = arith.addf %27, %28 : vector<9x2x128xf32>
    %cst_15 = arith.constant 1.000000e+00 : f32
    %30 = vector.broadcast %cst_15 : f32 to vector<9x2x128xf32>
    %31 = arith.addf %30, %23 : vector<9x2x128xf32>
    %32 = arith.addf %31, %7 : vector<9x2x128xf32>
    %33 = vector.broadcast %11 : vector<1x2x128xf32> to vector<9x2x128xf32>
    %34 = arith.mulf %33, %29 : vector<9x2x128xf32>
    %35 = arith.mulf %32, %34 : vector<9x2x128xf32>
    %36 = vector.broadcast %11 : vector<1x2x128xf32> to vector<9x2x128xf32>
    %37 = arith.mulf %23, %36 : vector<9x2x128xf32>
    %38 = vector.broadcast %11 : vector<1x2x128xf32> to vector<9x2x128xf32>
    %39 = arith.mulf %7, %38 : vector<9x2x128xf32>
    %c0_16 = arith.constant 0 : index
    %c0_17 = arith.constant 0 : index
    %c0_18 = arith.constant 0 : index
    %40 = vector.load %arg6[%c0_16, %c0_17, %c0_18] : memref<4x9x128xf32, #tpu.memory_space<vmem>>, vector<1x9x128xf32>
    %41 = vector.shape_cast %40 : vector<1x9x128xf32> to vector<9x128xf32>
    %cst_19 = arith.constant dense<0.000000e+00> : vector<9x128xf32>
    %42 = vector.multi_reduction <add>, %35, %cst_19 [1] : vector<9x2x128xf32> to vector<9x128xf32>
    %43 = arith.addf %41, %42 : vector<9x128xf32>
    %c0_20 = arith.constant 0 : index
    %c0_21 = arith.constant 0 : index
    %c0_22 = arith.constant 0 : index
    %44 = vector.load %arg6[%c0_20, %c0_21, %c0_22] : memref<4x9x128xf32, #tpu.memory_space<vmem>>, vector<1x9x128xf32>
    %45 = vector.shape_cast %44 : vector<1x9x128xf32> to vector<9x128xf32>
    %46 = vector.shape_cast %43 : vector<9x128xf32> to vector<1x9x128xf32>
    tpu.vector_store %arg6[%c0_20, %c0_21, %c0_22], %46 {strides = array<i32>} : memref<4x9x128xf32, #tpu.memory_space<vmem>>, vector<1x9x128xf32>,
    %c1 = arith.constant 1 : index
    %c0_23 = arith.constant 0 : index
    %c0_24 = arith.constant 0 : index
    %47 = vector.load %arg6[%c1, %c0_23, %c0_24] : memref<4x9x128xf32, #tpu.memory_space<vmem>>, vector<1x9x128xf32>
    %48 = vector.shape_cast %47 : vector<1x9x128xf32> to vector<9x128xf32>
    %49 = arith.mulf %37, %39 : vector<9x2x128xf32>
    %cst_25 = arith.constant dense<0.000000e+00> : vector<9x128xf32>
    %50 = vector.multi_reduction <add>, %49, %cst_25 [1] : vector<9x2x128xf32> to vector<9x128xf32>
    %51 = arith.addf %48, %50 : vector<9x128xf32>
    %c1_26 = arith.constant 1 : index
    %c0_27 = arith.constant 0 : index
    %c0_28 = arith.constant 0 : index
    %52 = vector.load %arg6[%c1_26, %c0_27, %c0_28] : memref<4x9x128xf32, #tpu.memory_space<vmem>>, vector<1x9x128xf32>
    %53 = vector.shape_cast %52 : vector<1x9x128xf32> to vector<9x128xf32>
    %54 = vector.shape_cast %51 : vector<9x128xf32> to vector<1x9x128xf32>
    tpu.vector_store %arg6[%c1_26, %c0_27, %c0_28], %54 {strides = array<i32>} : memref<4x9x128xf32, #tpu.memory_space<vmem>>, vector<1x9x128xf32>,
    %c2 = arith.constant 2 : index
    %c0_29 = arith.constant 0 : index
    %c0_30 = arith.constant 0 : index
    %55 = vector.load %arg6[%c2, %c0_29, %c0_30] : memref<4x9x128xf32, #tpu.memory_space<vmem>>, vector<1x9x128xf32>
    %56 = vector.shape_cast %55 : vector<1x9x128xf32> to vector<9x128xf32>
    %cst_31 = arith.constant dense<0.000000e+00> : vector<9x128xf32>
    %57 = vector.multi_reduction <add>, %37, %cst_31 [1] : vector<9x2x128xf32> to vector<9x128xf32>
    %58 = arith.addf %56, %57 : vector<9x128xf32>
    %c2_32 = arith.constant 2 : index
    %c0_33 = arith.constant 0 : index
    %c0_34 = arith.constant 0 : index
    %59 = vector.load %arg6[%c2_32, %c0_33, %c0_34] : memref<4x9x128xf32, #tpu.memory_space<vmem>>, vector<1x9x128xf32>
    %60 = vector.shape_cast %59 : vector<1x9x128xf32> to vector<9x128xf32>
    %61 = vector.shape_cast %58 : vector<9x128xf32> to vector<1x9x128xf32>
    tpu.vector_store %arg6[%c2_32, %c0_33, %c0_34], %61 {strides = array<i32>} : memref<4x9x128xf32, #tpu.memory_space<vmem>>, vector<1x9x128xf32>,
    %c3 = arith.constant 3 : index
    %c0_35 = arith.constant 0 : index
    %c0_36 = arith.constant 0 : index
    %62 = vector.load %arg6[%c3, %c0_35, %c0_36] : memref<4x9x128xf32, #tpu.memory_space<vmem>>, vector<1x9x128xf32>
    %63 = vector.shape_cast %62 : vector<1x9x128xf32> to vector<9x128xf32>
    %cst_37 = arith.constant dense<0.000000e+00> : vector<9x128xf32>
    %64 = vector.multi_reduction <add>, %39, %cst_37 [1] : vector<9x2x128xf32> to vector<9x128xf32>
    %65 = arith.addf %63, %64 : vector<9x128xf32>
    %c3_38 = arith.constant 3 : index
    %c0_39 = arith.constant 0 : index
    %c0_40 = arith.constant 0 : index
    %66 = vector.load %arg6[%c3_38, %c0_39, %c0_40] : memref<4x9x128xf32, #tpu.memory_space<vmem>>, vector<1x9x128xf32>
    %67 = vector.shape_cast %66 : vector<1x9x128xf32> to vector<9x128xf32>
    %68 = vector.shape_cast %65 : vector<9x128xf32> to vector<1x9x128xf32>
    tpu.vector_store %arg6[%c3_38, %c0_39, %c0_40], %68 {strides = array<i32>} : memref<4x9x128xf32, #tpu.memory_space<vmem>>, vector<1x9x128xf32>,
    %c0_i32_41 = arith.constant 0 : i32
    %69 = arith.cmpi eq, %arg1, %c0_i32_41 : i32
    %70 = arith.extui %69 : i1 to i32
    %c0_i32_42 = arith.constant 0 : i32
    %71 = arith.cmpi ne, %70, %c0_i32_42 : i32
    scf.if %71 {
      %c0_43 = arith.constant 0 : index
      %c0_44 = arith.constant 0 : index
      %c0_45 = arith.constant 0 : index
      %72 = vector.load %arg6[%c0_43, %c0_44, %c0_45] : memref<4x9x128xf32, #tpu.memory_space<vmem>>, vector<4x9x128xf32>
      %c0_46 = arith.constant 0 : index
      %c0_47 = arith.constant 0 : index
      %c0_48 = arith.constant 0 : index
      %c0_49 = arith.constant 0 : index
      %73 = vector.load %arg5[%c0_46, %c0_47, %c0_48, %c0_49] : memref<1x4x9x128xf32, #tpu.memory_space<vmem>>, vector<1x4x9x128xf32>
      %74 = vector.shape_cast %73 : vector<1x4x9x128xf32> to vector<4x9x128xf32>
      %75 = vector.shape_cast %72 : vector<4x9x128xf32> to vector<1x4x9x128xf32>
      tpu.vector_store %arg5[%c0_46, %c0_47, %c0_48, %c0_49], %75 {strides = array<i32>} : memref<1x4x9x128xf32, #tpu.memory_space<vmem>>, vector<1x4x9x128xf32>,
    } else {
    }
    return
  }
  func.func @transform_0(%arg0: i32, %arg1: i32) -> (i32, i32, i32, i32) {
    %c0_i32 = arith.constant 0 : i32
    %c0_i32_0 = arith.constant 0 : i32
    %c0_i32_1 = arith.constant 0 : i32
    return %arg0, %c0_i32, %arg1, %c0_i32_0 : i32, i32, i32, i32
  }
  func.func @transform_1(%arg0: i32, %arg1: i32) -> (i32, i32, i32, i32) {
    %c0_i32 = arith.constant 0 : i32
    %c0_i32_0 = arith.constant 0 : i32
    %c0_i32_1 = arith.constant 0 : i32
    return %arg0, %c0_i32, %arg1, %c0_i32_0 : i32, i32, i32, i32
  }
  func.func @transform_2(%arg0: i32, %arg1: i32) -> (i32, i32, i32) {
    %c0_i32 = arith.constant 0 : i32
    %c0_i32_0 = arith.constant 0 : i32
    return %arg0, %arg1, %c0_i32 : i32, i32, i32
  }
  func.func @transform_3(%arg0: i32, %arg1: i32) -> (i32, i32, i32, i32) {
    %c0_i32 = arith.constant 0 : i32
    %c0_i32_0 = arith.constant 0 : i32
    %c0_i32_1 = arith.constant 0 : i32
    %c0_i32_2 = arith.constant 0 : i32
    return %arg0, %c0_i32, %c0_i32_0, %c0_i32_1 : i32, i32, i32, i32
  }
}

</mosaic_0001>

<bundles_post_ra>
// kernel: mlfcw_loss.1
= control target key start
LH: loop header
LB: loop body
LE: loop exit
PB: predicated region body
PF: predicated region fallthrough
CT: control target
= control target key end

     0   :  { %s1160_s12 = smov 0   ;;  %s1162_s13 = smov 0   ;;  %s1705_s0 = inlined_call_operand.vmem [shape: f32[2,9,2,128], index: 0, kind: input, shape index: {}]   ;;  %s1706_s1 = inlined_call_operand.vmem [shape: bf16[2,9,2,128], index: 1, kind: input, shape index: {}]   ;;  %s1707_s2 = inlined_call_operand.vmem [shape: bf16[2,2,128], index: 2, kind: input, shape index: {}]   ;;  %s1708_s3 = inlined_call_operand.vmem [shape: f32[2,4,9,128], index: 3, kind: output, shape index: {}]  }
   0x1   :  { %s1164_s14 = smov 0  }
   0x2 LB: > { %s25_s15 = sadd.s32 1, %s1133_s13  ;;  %p1027_p0 = scmp.ge.s32.totalorder %s1137_s14, 1  ;;  %s1137_s14 = sphi %s1164_s14, %s13_s14   ;;  %s1133_s13 = sphi %s1162_s13, %s1732_s13   ;;  %s1129_s12 = sphi %s1160_s12, %s1731_s12  }
   0x3   : > { %p27_p1 = scmp.ge.s32.totalorder %s25_s15, 2  ;;  %p181_p2 = scmp.lt.s32.totalorder %s1137_s14, 3 }
   0x5   : > { %s1734_s15 = smov (%p27_p1, %s25_s15), 0  ;;  %p182_p3 = pnand %p1027_p0, %p181_p2 }
   0x7   : > { %185 = sbr.rel (%p182_p3) target bundleno = 180 (0xb4), region = 32 }
   0xe   : > { %p221_p4 = scmp.lt.s32.totalorder %s1129_s12, 1  ;;  %v1139_v0 = vmov 0.0  }
   0xf   : > { %252 = vst [vmem:[#allocation2 + $0x8] sm:$0x1] %v1139_v0  ;;  %254 = vst [vmem:[#allocation2 + $0x18] sm:$0x1] %v1139_v0 }
  0x10   : > { %256 = vst [vmem:[#allocation2 + $0x28] sm:$0x1] %v1139_v0  ;;  %258 = vst [vmem:[#allocation2 + $0x38] sm:$0x1] %v1139_v0  ;;  %s1736_s12 = smov (!%p221_p4, %s1129_s12), 1 }
  0x11   : > { %s1034_s16 = smul.u32 18, %s1736_s12  ;;  %s241_s23 = scalar_lea.vmem %s1707_s2, %s1736_s12 }
  0x12   : > { %s1035_s20 = smul.u32 9, %s1736_s12  ;;  %v286_v9 = vld [vmem:[%s241_s23] sm:$0x1]  ;;  %s1033_s27 = sshll.u32 %s1736_s12, 6 }
  0x13   : > { %s1184_s19 = scalar_lea.vmem %s1705_s0, %s1034_s16  ;;  %v1235_v31 = vunpack.c.l.bf16 %v286_v9  ;;  %s1565_s30 = scalar_lea.vmem %s1708_s3, %s1033_s27 }
  0x14   : > { %v1192_v1 = vld [vmem:[%s1184_s19] sm:$0x3]  ;;  %s1197_s26 = scalar_lea.vmem %s1706_s1, %s1035_s20  ;;  %v1200_v2 = vld [vmem:[%s1184_s19 + $0x2] sm:$0x3]  ;;  %v1203_v3 = vld [vmem:[%s1184_s19 + $0x4] sm:$0x3] }
  0x15   : > { %v1206_v4 = vld [vmem:[%s1184_s19 + $0x6] sm:$0x3]  ;;  %v1209_v5 = vld [vmem:[%s1184_s19 + $0x8] sm:$0x3]  ;;  %v1212_v6 = vld [vmem:[%s1184_s19 + $0xa] sm:$0x3] }
  0x16   : > { %v1215_v7 = vld [vmem:[%s1184_s19 + $0xc] sm:$0x3]  ;;  %v1218_v8 = vld [vmem:[%s1184_s19 + $0xe] sm:$0x3]  ;;  %v288_v10 = vand.u32 2147483647, %v1192_v1 }
  0x17   : > { %v268_v11 = vld [vmem:[%s1197_s26] sm:$0x1]  ;;  %v289_v12 = vand.u32 2147483647, %v1200_v2  ;;  %v290_v13 = vand.u32 2147483647, %v1203_v3 }
  0x18   : > { %v291_v14 = vand.u32 2147483647, %v1206_v4  ;;  %v269_v15 = vld [vmem:[%s1197_s26 + $0x1] sm:$0x1]  ;;  %v270_v16 = vld [vmem:[%s1197_s26 + $0x2] sm:$0x1]  ;;  %v1237_v35 = vunpack.c.l.bf16 %v268_v11 }
  0x19   : > { %v292_v17 = vand.u32 2147483647, %v1209_v5  ;;  %v293_v18 = vand.u32 2147483647, %v1212_v6  ;;  %v294_v19 = vand.u32 2147483647, %v1215_v7  ;;  %v1240_v40 = vunpack.c.l.bf16 %v269_v15 }
  0x1a   : > { %v271_v20 = vld [vmem:[%s1197_s26 + $0x3] sm:$0x1]  ;;  %v272_v21 = vld [vmem:[%s1197_s26 + $0x4] sm:$0x1]  ;;  %v295_v22 = vand.u32 2147483647, %v1218_v8  ;;  %v1242_v41 = vunpack.c.l.bf16 %v270_v16  ;;  %v378_v51 = vmul.f32 %v1237_v35, %v1192_v1 }
  0x1b   : > { %v297_v23 = vsub.f32 0.0, %v288_v10  ;;  %v298_v24 = vsub.f32 0.0, %v289_v12  ;;  %v299_v25 = vsub.f32 0.0, %v290_v13  ;;  %v273_v26 = vld [vmem:[%s1197_s26 + $0x5] sm:$0x1]  ;;  %v300_v28 = vsub.f32 0.0, %v291_v14 }
  0x1c   : > { %v274_v27 = vld [vmem:[%s1197_s26 + $0x6] sm:$0x1]  ;;  %v301_v29 = vsub.f32 0.0, %v292_v17  ;;  %v302_v30 = vsub.f32 0.0, %v293_v18  ;;  %v303_v32 = vsub.f32 0.0, %v294_v19  ;;  %v304_v36 = vsub.f32 0.0, %v295_v22 }
  0x1d   : > { %v306_v33 = vmul.f32 1.442695, %v297_v23  ;;  %v308_v34 = vmul.f32 1.442695, %v298_v24  ;;  %v310_v37 = vmul.f32 1.442695, %v299_v25  ;;  %v1244_v43 = vunpack.c.l.bf16 %v271_v20 }
  0x1e   : > { %v312_v38 = vmul.f32 1.442695, %v300_v28  ;;  %v275_v39 = vld [vmem:[%s1197_s26 + $0x7] sm:$0x1]  ;;  %1710 = vst [vmem:[#allocation3_spill] sm:$0xff] %v1240_v40  ;;  %v1246_v44 = vunpack.c.l.bf16 %v272_v21  ;;  %v1248_v46 = vunpack.c.l.bf16 %v273_v26  ;;  %v1250_v47 = vunpack.c.l.bf16 %v274_v27 }
  0x1f   : > { %1061 = vpow2.f32 %v306_v33  ;;  %v314_v42 = vmul.f32 1.442695, %v301_v29  ;;  %v316_v45 = vmul.f32 1.442695, %v302_v30  ;;  %v318_v48 = vmul.f32 1.442695, %v303_v32 }
  0x20   : > { %1063 = vpow2.f32 %v308_v34  ;;  %v1252_v49 = vunpack.c.l.bf16 %v275_v39  ;;  %v320_v50 = vmul.f32 1.442695, %v304_v36  ;;  %vm342_vm0 = vcmp.ge.f32.partialorder %v1192_v1, 0.0  ;;  %v1294_v15 = vld [vmem:[%s1184_s19 + $0x10] sm:$0x3] }
  0x21   : > { %1065 = vpow2.f32 %v310_v37  ;;  %v369_v52 = vmax.f32 %v1192_v1, 0.0  ;;  %v379_v53 = vmul.f32 %v1240_v40, %v1200_v2  ;;  %vm343_vm1 = vcmp.ge.f32.partialorder %v1200_v2, 0.0  ;;  %v276_v16 = vld [vmem:[%s1197_s26 + $0x8] sm:$0x1] }
  0x22   : > { %1067 = vpow2.f32 %v312_v38  ;;  %v370_v54 = vmax.f32 %v1200_v2, 0.0  ;;  %v371_v55 = vmax.f32 %v1203_v3, 0.0  ;;  %v372_v56 = vmax.f32 %v1206_v4, 0.0 }
  0x23   : > { %1069 = vpow2.f32 %v314_v42  ;;  %v373_v57 = vmax.f32 %v1209_v5, 0.0  ;;  %v374_v58 = vmax.f32 %v1212_v6, 0.0  ;;  %v380_v59 = vmul.f32 %v1242_v41, %v1203_v3 }
  0x24   : > { %1071 = vpow2.f32 %v316_v45  ;;  %v375_v60 = vmax.f32 %v1215_v7, 0.0  ;;  %v381_v61 = vmul.f32 %v1244_v43, %v1206_v4  ;;  %v382_v62 = vmul.f32 %v1246_v44, %v1209_v5 }
  0x25   : > { %1073 = vpow2.f32 %v318_v48  ;;  %v376_v63 = vmax.f32 %v1218_v8, 0.0  ;;  %v383_v0 = vmul.f32 %v1248_v46, %v1212_v6  ;;  %v384_v9 = vmul.f32 %v1250_v47, %v1215_v7 }
  0x26   : > { %1075 = vpow2.f32 %v320_v50  ;;  %v385_v10 = vmul.f32 %v1252_v49, %v1218_v8  ;;  %vm344_vm2 = vcmp.ge.f32.partialorder %v1203_v3, 0.0  ;;  %vm345_vm3 = vcmp.ge.f32.partialorder %v1206_v4, 0.0 }
  0x27   : > { %vm346_vm4 = vcmp.ge.f32.partialorder %v1209_v5, 0.0  ;;  %vm347_vm5 = vcmp.ge.f32.partialorder %v1212_v6, 0.0  ;;  %vm348_vm6 = vcmp.ge.f32.partialorder %v1215_v7, 0.0  ;;  %v1287_v12 = vsub.f32 %v369_v52, %v378_v51 }
  0x28   : > { %v1289_v13 = vsub.f32 %v370_v54, %v379_v53  ;;  %v1291_v14 = vsub.f32 %v371_v55, %v380_v59  ;;  %vm349_vm7 = vcmp.ge.f32.partialorder %v1218_v8, 0.0  ;;  %v1301_v19 = vsub.f32 %v372_v56, %v381_v61 }
  0x29   : > { %v1284_v11 = vpop.eup %1061  ;;  %v1303_v20 = vsub.f32 %v373_v57, %v382_v62  ;;  %v1309_v24 = vsub.f32 %v374_v58, %v383_v0  ;;  %v1311_v25 = vsub.f32 %v375_v60, %v384_v9  ;;  %v1313_v26 = vsub.f32 %v376_v63, %v385_v10 }
  0x2a   : > { %v1297_v17 = vpop.eup %1063  ;;  %v324_v18 = vadd.f32 1.0, %v1284_v11  ;;  %v399_v21 = vmul.f32 -0.5, %v1284_v11  ;;  %v1318_v29 = vunpack.c.l.bf16 %v276_v16  ;;  %v351_v34 = vsel %vm342_vm0, 1.0, %v1284_v11 }
  0x2b   : > { %v1306_v22 = vpop.eup %1065  ;;  %v325_v23 = vadd.f32 1.0, %v1297_v17  ;;  %v408_v36 = vmul.f32 -0.5, %v1297_v17  ;;  %v402_v42 = vand.u32 2147483647, %v1284_v11  ;;  %v352_v1 = vsel %vm343_vm1, 1.0, %v1297_v17 }
  0x2c   : > { %v1315_v27 = vpop.eup %1067  ;;  %v326_v28 = vadd.f32 1.0, %v1306_v22  ;;  %1077 = vrcp.f32 %v324_v18  ;;  %v400_v39 = vadd.f32 1.0, %v399_v21  ;;  %v411_v50 = vand.u32 2147483647, %v1297_v17 }
  0x2d   : > { %v1321_v32 = vpop.eup %1069  ;;  %v327_v33 = vadd.f32 1.0, %v1315_v27  ;;  %1079 = vrcp.f32 %v325_v23  ;;  %v353_v53 = vsel %vm344_vm2, 1.0, %v1306_v22  ;;  %v354_v54 = vsel %vm345_vm3, 1.0, %v1315_v27 }
  0x2e   : > { %v1328_v37 = vpop.eup %1071  ;;  %v328_v38 = vadd.f32 1.0, %v1321_v32  ;;  %1081 = vrcp.f32 %v326_v28  ;;  %v355_v2 = vsel %vm346_vm4, 1.0, %v1321_v32  ;;  %v409_v56 = vadd.f32 1.0, %v408_v36 }
  0x2f   : > { %v1332_v45 = vpop.eup %1073  ;;  %v329_v48 = vadd.f32 1.0, %v1328_v37  ;;  %1083 = vrcp.f32 %v327_v33  ;;  %v1353_v57 = vmul.f32 %v1284_v11, %v400_v39  ;;  %v417_v58 = vmul.f32 -0.5, %v1306_v22 }
  0x30   : > { %v1339_v51 = vpop.eup %1075  ;;  %v330_v52 = vadd.f32 1.0, %v1332_v45  ;;  %1085 = vrcp.f32 %v328_v38  ;;  %v426_v3 = vmul.f32 -0.5, %v1315_v27  ;;  %v356_v4 = vsel %vm347_vm5, 1.0, %v1328_v37 }
  0x31   : > { %v331_v55 = vadd.f32 1.0, %v1339_v51  ;;  %1087 = vrcp.f32 %v329_v48  ;;  %v357_v59 = vsel %vm348_vm6, 1.0, %v1332_v45  ;;  %v435_v5 = vmul.f32 -0.5, %v1321_v32 }
  0x32   : > { %1089 = vrcp.f32 %v330_v52  ;;  %v418_v60 = vadd.f32 1.0, %v417_v58  ;;  %v420_v61 = vand.u32 2147483647, %v1306_v22  ;;  %v427_v62 = vadd.f32 1.0, %v426_v3 }
  0x33   : > { %1091 = vrcp.f32 %v331_v55  ;;  %v358_v63 = vsel %vm349_vm7, 1.0, %v1339_v51  ;;  %v1369_v0 = vmul.f32 %v1297_v17, %v409_v56  ;;  %v429_v6 = vand.u32 2147483647, %v1315_v27 }
  0x34   : > { %1093 = vlog2.f32 %v324_v18  ;;  %vm1372_vm8 = vcmp.lt.f32.partialorder %v402_v42, 0.0004427343  ;;  %v436_v10 = vadd.f32 1.0, %v435_v5  ;;  %v438_v11 = vand.u32 2147483647, %v1321_v32 }
  0x35   : > { %1095 = vlog2.f32 %v325_v23  ;;  %v444_v16 = vmul.f32 -0.5, %v1328_v37  ;;  %vm1378_vm9 = vcmp.lt.f32.partialorder %v411_v50, 0.0004427343  ;;  %v1383_v17 = vmul.f32 %v1306_v22, %v418_v60 }
  0x36   : > { %v1078_v9 = vpop.eup %1077  ;;  %1097 = vlog2.f32 %v326_v28  ;;  %v1386_v21 = vmul.f32 %v1315_v27, %v427_v62  ;;  %v447_v23 = vand.u32 2147483647, %v1328_v37  ;;  %vm1391_vm10 = vcmp.lt.f32.partialorder %v420_v61, 0.0004427343 }
  0x37   : > { %v1080_v18 = vpop.eup %1079  ;;  %1099 = vlog2.f32 %v327_v33  ;;  %v1389_v36 = vmul.f32 %v1078_v9, %v351_v34  ;;  %v445_v42 = vadd.f32 1.0, %v444_v16  ;;  %v453_v50 = vmul.f32 -0.5, %v1332_v45 }
  0x38   : > { %v1082_v28 = vpop.eup %1081  ;;  %1101 = vlog2.f32 %v328_v38  ;;  %v1396_v22 = vmul.f32 %v1080_v18, %v352_v1  ;;  %vm1400_vm11 = vcmp.lt.f32.partialorder %v429_v6, 0.0004427343  ;;  %v456_v34 = vand.u32 2147483647, %v1332_v45 }
  0x39   : > { %v1084_v56 = vpop.eup %1083  ;;  %v1398_v33 = vmul.f32 %v1082_v28, %v353_v53  ;;  %1103 = vlog2.f32 %v329_v48  ;;  %v1408_v38 = vmul.f32 %v1321_v32, %v436_v10  ;;  %vm1410_vm12 = vcmp.lt.f32.partialorder %v438_v11, 0.0004427343 }
  0x3a   : > { %v1086_v58 = vpop.eup %1085  ;;  %v1405_v3 = vmul.f32 %v1084_v56, %v354_v54  ;;  %1105 = vlog2.f32 %v330_v52  ;;  %v454_v1 = vadd.f32 1.0, %v453_v50  ;;  %v446_v61 = vmul.f32 %v1328_v37, %v445_v42 }
  0x3b   : > { %v1088_v53 = vpop.eup %1087  ;;  %v1414_v60 = vmul.f32 %v1086_v58, %v355_v2  ;;  %vm1417_vm13 = vcmp.lt.f32.partialorder %v447_v23, 0.0004427343  ;;  %1107 = vlog2.f32 %v331_v55  ;;  %v462_v54 = vmul.f32 -0.5, %v1339_v51 }
  0x3c   : > { %v1090_v32 = vpop.eup %1089  ;;  %v1422_v62 = vmul.f32 %v1088_v53, %v356_v4  ;;  %v455_v6 = vmul.f32 %v1332_v45, %v454_v1  ;;  %vm1425_vm14 = vcmp.lt.f32.partialorder %v456_v34, 0.0004427343  ;;  %v465_v2 = vand.u32 2147483647, %v1339_v51 }
  0x3d   : > { %v486_v37 = vadd.f32 1.0, %v1389_v36  ;;  %v1092_v9 = vpop.eup %1091  ;;  %v1431_v10 = vmul.f32 %v1090_v32, %v357_v59  ;;  %v463_v11 = vadd.f32 1.0, %v462_v54  ;;  %v487_v55 = vadd.f32 1.0, %v1396_v22 }
  0x3e   : > { %v488_v16 = vadd.f32 1.0, %v1398_v33  ;;  %v1094_v4 = vpop.eup %1093  ;;  %v1435_v18 = vmul.f32 %v1092_v9, %v358_v63  ;;  %vm1437_vm15 = vcmp.lt.f32.partialorder %v465_v2, 0.0004427343  ;;  %v489_v23 = vadd.f32 1.0, %v1405_v3 }
  0x3f   : > { %v490_v28 = vadd.f32 1.0, %v1414_v60  ;;  %v1096_v42 = vpop.eup %1095  ;;  %v398_v50 = vmul.f32 0.6931472, %v1094_v4  ;;  %v464_v59 = vmul.f32 %v1339_v51, %v463_v11  ;;  %v491_v56 = vadd.f32 1.0, %v1422_v62 }
  0x40   : > { %v492_v34 = vadd.f32 1.0, %v1431_v10  ;;  %v1098_v58 = vpop.eup %1097  ;;  %v407_v1 = vmul.f32 0.6931472, %v1096_v42  ;;  %v493_v63 = vadd.f32 1.0, %v1435_v18  ;;  %v495_v53 = vadd.f32 %v486_v37, %v1237_v35 }
  0x41   : > { %v496_v54 = vadd.f32 %v487_v55, %v1240_v40  ;;  %vm542_vm0 = vcmask 1041408   ;;  %v1100_v32 = vpop.eup %1099  ;;  %v404_v2 = vsel %vm1372_vm8, %v1353_v57, %v398_v50  ;;  %v416_v9 = vmul.f32 0.6931472, %v1098_v58 }
  0x42   : > { %v497_v51 = vadd.f32 %v488_v16, %v1242_v41  ;;  %v498_v11 = vadd.f32 %v489_v23, %v1244_v43  ;;  %v1102_v4 = vpop.eup %1101  ;;  %v413_v42 = vsel %vm1378_vm9, %v1369_v0, %v407_v1  ;;  %v425_v30 = vmul.f32 0.6931472, %v1100_v32 }
  0x43   : > { %v477_v37 = vadd.f32 %v404_v2, %v1287_v12  ;;  %v499_v55 = vadd.f32 %v490_v28, %v1246_v44  ;;  %v1104_v40 = vpop.eup %1103  ;;  %v422_v57 = vsel %vm1391_vm10, %v1383_v17, %v416_v9  ;;  %v434_v7 = vmul.f32 0.6931472, %v1102_v4 }
  0x44   : > { %v478_v16 = vadd.f32 %v413_v42, %v1289_v13  ;;  %v500_v23 = vadd.f32 %v491_v56, %v1248_v46  ;;  %v1106_v50 = vpop.eup %1105  ;;  %v431_v0 = vsel %vm1400_vm11, %v1386_v21, %v425_v30  ;;  %v443_v8 = vmul.f32 0.6931472, %v1104_v40 }
  0x45   : > { %v479_v12 = vadd.f32 %v422_v57, %v1291_v14  ;;  %v501_v28 = vadd.f32 %v492_v34, %v1250_v47  ;;  %v1108_v58 = vpop.eup %1107  ;;  %v440_v17 = vsel %vm1410_vm12, %v1408_v38, %v434_v7  ;;  %v452_v39 = vmul.f32 0.6931472, %v1106_v50 }
  0x46   : > { %v480_v13 = vadd.f32 %v431_v0, %v1301_v19  ;;  %v502_v56 = vadd.f32 %v493_v63, %v1252_v49  ;;  %v449_v1 = vsel %vm1417_vm13, %v446_v61, %v443_v8  ;;  %v461_v27 = vmul.f32 0.6931472, %v1108_v58 }
  0x47   : > { %v481_v40 = vadd.f32 %v440_v17, %v1303_v20  ;;  %v504_v14 = vmul.f32 %v477_v37, %v1235_v31  ;;  %v458_v30 = vsel %vm1425_vm14, %v455_v6, %v452_v39  ;;  %v482_v21 = vadd.f32 %v449_v1, %v1309_v24 }
  0x48   : > { %v505_v38 = vmul.f32 %v478_v16, %v1235_v31  ;;  %v506_v5 = vmul.f32 %v479_v12, %v1235_v31  ;;  %v467_v19 = vsel %vm1437_vm15, %v464_v59, %v461_v27  ;;  %v483_v48 = vadd.f32 %v458_v30, %v1311_v25 }
  0x49   : > { %v507_v61 = vmul.f32 %v480_v13, %v1235_v31  ;;  %v508_v20 = vmul.f32 %v481_v40, %v1235_v31  ;;  %v484_v34 = vadd.f32 %v467_v19, %v1313_v26  ;;  %v509_v52 = vmul.f32 %v482_v21, %v1235_v31 }
  0x4a   : > { %v513_v6 = vmul.f32 %v504_v14, %v495_v53  ;;  %v514_v63 = vmul.f32 %v505_v38, %v496_v54  ;;  %v510_v24 = vmul.f32 %v483_v48, %v1235_v31  ;;  %v515_v32 = vmul.f32 %v506_v5, %v497_v51 }
  0x4b   : > { %v516_v2 = vmul.f32 %v507_v61, %v498_v11  ;;  %v517_v9 = vmul.f32 %v508_v20, %v499_v55  ;;  %v511_v45 = vmul.f32 %v484_v34, %v1235_v31  ;;  %v518_v59 = vmul.f32 %v509_v52, %v500_v23 }
  0x4c   : > { %v543_v25 = vsel %vm542_vm0, %v513_v6, 0.0  ;;  %v550_v4 = vsel %vm542_vm0, %v514_v63, 0.0  ;;  %v519_v42 = vmul.f32 %v510_v24, %v501_v28  ;;  %v557_v26 = vsel %vm542_vm0, %v515_v32, 0.0 }
  0x4d   : > { %v544_v37 = vrot.slane %v543_v25, 4  ;;  %v551_v57 = vrot.slane %v550_v4, 4  ;;  %v520_v7 = vmul.f32 %v511_v45, %v502_v56  ;;  %v558_v53 = vrot.slane %v557_v26, 4 }
  0x4e   : > { %v564_v54 = vsel %vm542_vm0, %v516_v2, 0.0  ;;  %v571_v51 = vsel %vm542_vm0, %v517_v9, 0.0  ;;  %vm615_vm1 = vcmask 1041409   ;;  %vm617_vm2 = vcmask 1042434  }
  0x4f   : > { %v545_v11 = vadd.f32 %v544_v37, %v543_v25  ;;  %v552_v55 = vadd.f32 %v551_v57, %v550_v4  ;;  %v565_v16 = vrot.slane %v564_v54, 4  ;;  %v572_v23 = vrot.slane %v571_v51, 4 }
  0x50   : > { %v559_v50 = vadd.f32 %v558_v53, %v557_v26  ;;  %v578_v0 = vsel %vm542_vm0, %v518_v59, 0.0  ;;  %v585_v8 = vsel %vm542_vm0, %v519_v42, 0.0  ;;  %v592_v12 = vsel %vm542_vm0, %v520_v7, 0.0 }
  0x51   : > { %vm619_vm3 = vcmask 1043459   ;;  %v546_v28 = vrot.slane %v545_v11, 2  ;;  %v553_v58 = vrot.slane %v552_v55, 2  ;;  %v566_v17 = vadd.f32 %v565_v16, %v564_v54 }
  0x52   : > { %v573_v39 = vadd.f32 %v572_v23, %v571_v51  ;;  %vm621_vm4 = vcmask 1044484   ;;  %v560_v13 = vrot.slane %v559_v50, 2  ;;  %v579_v56 = vrot.slane %v578_v0, 4 }
  0x53   : > { %v586_v1 = vrot.slane %v585_v8, 4  ;;  %v593_v27 = vrot.slane %v592_v12, 4  ;;  %v547_v40 = vadd.f32 %v546_v28, %v545_v11  ;;  %v554_v14 = vadd.f32 %v553_v58, %v552_v55 }
  0x54   : > { %v567_v30 = vrot.slane %v566_v17, 2  ;;  %v574_v21 = vrot.slane %v573_v39, 2  ;;  %vm623_vm5 = vcmask 1045509   ;;  %v561_v38 = vadd.f32 %v560_v13, %v559_v50 }
  0x55   : > { %v580_v5 = vadd.f32 %v579_v56, %v578_v0  ;;  %v587_v19 = vadd.f32 %v586_v1, %v585_v8  ;;  %v594_v48 = vadd.f32 %v593_v27, %v592_v12  ;;  %vm625_vm6 = vcmask 1046534  }
  0x56   : > { %v548_v61 = vrot.slane %v547_v40, 1  ;;  %v555_v20 = vrot.slane %v554_v14, 1  ;;  %v568_v34 = vadd.f32 %v567_v30, %v566_v17  ;;  %v575_v52 = vadd.f32 %v574_v21, %v573_v39 }
  0x57   : > { %vm627_vm7 = vcmask 1047559   ;;  %v562_v6 = vrot.slane %v561_v38, 1  ;;  %v581_v63 = vrot.slane %v580_v5, 2  ;;  %v588_v24 = vrot.slane %v587_v19, 2 }
  0x58   : > { %v595_v32 = vrot.slane %v594_v48, 2  ;;  %v549_v2 = vadd.f32 %v548_v61, %v547_v40  ;;  %v556_v9 = vadd.f32 %v555_v20, %v554_v14  ;;  %v569_v45 = vrot.slane %v568_v34, 1 }
  0x59   : > { %v576_v59 = vrot.slane %v575_v52, 1  ;;  %v563_v25 = vadd.f32 %v562_v6, %v561_v38  ;;  %v582_v4 = vadd.f32 %v581_v63, %v580_v5  ;;  %v589_v42 = vadd.f32 %v588_v24, %v587_v19 }
  0x5a   : > { %v596_v37 = vadd.f32 %v595_v32, %v594_v48  ;;  %v570_v57 = vadd.f32 %v569_v45, %v568_v34  ;;  %v616_v7 = vsel %vm615_vm1, %v556_v9, %v549_v2  ;;  %v1727_v53 = vand.u32 2147483647, %v1294_v15 }
  0x5b   : > { %v577_v26 = vadd.f32 %v576_v59, %v575_v52  ;;  %v583_v51 = vrot.slane %v582_v4, 1  ;;  %v590_v11 = vrot.slane %v589_v42, 1  ;;  %v618_v16 = vsel %vm617_vm2, %v563_v25, %v616_v7 }
  0x5c   : > { %v305_v54 = vsub.f32 0.0, %v1727_v53  ;;  %v597_v55 = vrot.slane %v596_v37, 1  ;;  %v620_v23 = vsel %vm619_vm3, %v570_v57, %v618_v16  ;;  %v377_v0 = vmax.f32 %v1294_v15, 0.0 }
  0x5d   : > { %v386_v8 = vmul.f32 %v1318_v29, %v1294_v15  ;;  %v584_v12 = vadd.f32 %v583_v51, %v582_v4  ;;  %v591_v28 = vadd.f32 %v590_v11, %v589_v42  ;;  %v622_v17 = vsel %vm621_vm4, %v577_v26, %v620_v23 }
  0x5e   : > { %v322_v50 = vmul.f32 1.442695, %v305_v54  ;;  %v598_v58 = vadd.f32 %v597_v55, %v596_v37  ;;  %v1511_v39 = vmul.f32 %v1389_v36, %v1235_v31  ;;  %v1515_v13 = vmul.f32 %v1396_v22, %v1235_v31 }
  0x5f   : > { %v1519_v56 = vmul.f32 %v1398_v33, %v1235_v31  ;;  %v624_v1 = vsel %vm623_vm5, %v584_v12, %v622_v17  ;;  %v1525_v27 = vmul.f32 %v1405_v3, %v1235_v31  ;;  %v1529_v40 = vmul.f32 %v1414_v60, %v1235_v31 }
  0x60   : > { %1109 = vpow2.f32 %v322_v50  ;;  %v1533_v36 = vmul.f32 %v1422_v62, %v1235_v31  ;;  %v626_v22 = vsel %vm625_vm6, %v591_v28, %v624_v1  ;;  %vm350_vm8 = vcmp.ge.f32.partialorder %v1294_v15, 0.0  ;;  %v1728_v62 = vld [vmem:[#allocation3_spill] sm:$0xff] }
  0x61   : > { %v1539_v33 = vmul.f32 %v1431_v10, %v1235_v31  ;;  %v1543_v3 = vmul.f32 %v1435_v18, %v1235_v31  ;;  %v1547_v60 = vmul.f32 %v1235_v31, %v1237_v35  ;;  %v628_v14 = vsel %vm627_vm7, %v598_v58, %v626_v22 }
  0x62   : > { %v1552_v30 = vmul.f32 %v1235_v31, %v1728_v62  ;;  %v1556_v21 = vmul.f32 %v1235_v31, %v1242_v41  ;;  %v1560_v10 = vmul.f32 %v1235_v31, %v1244_v43  ;;  %v1569_v35 = vmul.f32 %v1235_v31, %v1246_v44  ;;  %919 = vst [vmem:[%s1565_s30] sm:$0xff] %v628_v14 }
  0x63   : > { %v1573_v18 = vmul.f32 %v1235_v31, %v1248_v46  ;;  %v1577_v41 = vmul.f32 %v1235_v31, %v1250_v47  ;;  %v1581_v43 = vmul.f32 %v1235_v31, %v1252_v49  ;;  %v638_v38 = vmul.f32 %v1547_v60, %v1511_v39 }
  0x64   : > { %v639_v5 = vmul.f32 %v1552_v30, %v1515_v13  ;;  %v640_v44 = vmul.f32 %v1556_v21, %v1519_v56  ;;  %v1589_v19 = vsub.f32 %v377_v0, %v386_v8  ;;  %v641_v46 = vmul.f32 %v1560_v10, %v1525_v27 }
  0x65   : > { %v642_v47 = vmul.f32 %v1569_v35, %v1529_v40  ;;  %v643_v49 = vmul.f32 %v1573_v18, %v1533_v36  ;;  %v644_v48 = vmul.f32 %v1577_v41, %v1539_v33  ;;  %v647_v61 = vsel %vm542_vm0, %v638_v38, 0.0 }
  0x66   : > { %v654_v20 = vsel %vm542_vm0, %v639_v5, 0.0  ;;  %v661_v34 = vsel %vm542_vm0, %v640_v44, 0.0  ;;  %v648_v52 = vrot.slane %v647_v61, 4  ;;  %v668_v24 = vsel %vm542_vm0, %v641_v46, 0.0 }
  0x67   : > { %v655_v6 = vrot.slane %v654_v20, 4  ;;  %v662_v63 = vrot.slane %v661_v34, 4  ;;  %v645_v32 = vmul.f32 %v1581_v43, %v1543_v3  ;;  %v669_v2 = vrot.slane %v668_v24, 4 }
  0x68   : > { %v675_v9 = vsel %vm542_vm0, %v642_v47, 0.0  ;;  %v682_v45 = vsel %vm542_vm0, %v643_v49, 0.0  ;;  %v649_v25 = vadd.f32 %v648_v52, %v647_v61  ;;  %v689_v53 = vsel %vm542_vm0, %v644_v48, 0.0 }
  0x69   : > { %v656_v4 = vadd.f32 %v655_v6, %v654_v20  ;;  %v663_v42 = vadd.f32 %v662_v63, %v661_v34  ;;  %v676_v37 = vrot.slane %v675_v9, 4  ;;  %v670_v55 = vadd.f32 %v669_v2, %v668_v24 }
  0x6a   : > { %v1110_v59 = vpop.eup %1109  ;;  %v650_v54 = vrot.slane %v649_v25, 2  ;;  %v683_v1 = vrot.slane %v682_v45, 4  ;;  %v690_v5 = vrot.slane %v689_v53, 4  ;;  %v696_v47 = vsel %vm542_vm0, %v645_v32, 0.0 }
  0x6b   : > { %v332_v57 = vadd.f32 1.0, %v1110_v59  ;;  %v471_v26 = vmul.f32 -0.5, %v1110_v59  ;;  %v474_v7 = vand.u32 2147483647, %v1110_v59  ;;  %v657_v51 = vrot.slane %v656_v4, 2 }
  0x6c   : > { %v664_v11 = vrot.slane %v663_v42, 2  ;;  %v359_v16 = vsel %vm350_vm8, 1.0, %v1110_v59  ;;  %v677_v50 = vadd.f32 %v676_v37, %v675_v9  ;;  %v651_v0 = vadd.f32 %v650_v54, %v649_v25 }
  0x6d   : > { %1111 = vrcp.f32 %v332_v57  ;;  %v472_v23 = vadd.f32 1.0, %v471_v26  ;;  %v658_v8 = vadd.f32 %v657_v51, %v656_v4  ;;  %v671_v58 = vrot.slane %v670_v55, 2 }
  0x6e   : > { %1113 = vlog2.f32 %v332_v57  ;;  %v665_v12 = vadd.f32 %v664_v11, %v663_v42  ;;  %v678_v17 = vrot.slane %v677_v50, 2  ;;  %vm1611_vm9 = vcmp.lt.f32.partialorder %v474_v7, 0.0004427343 }
  0x6f   : > { %v473_v28 = vmul.f32 %v1110_v59, %v472_v23  ;;  %v652_v14 = vrot.slane %v651_v0, 1  ;;  %v659_v62 = vrot.slane %v658_v8, 1  ;;  %v672_v15 = vadd.f32 %v671_v58, %v670_v55 }
  0x70   : > { %v666_v38 = vrot.slane %v665_v12, 1  ;;  %v679_v44 = vadd.f32 %v678_v17, %v677_v50  ;;  %v684_v46 = vadd.f32 %v683_v1, %v682_v45  ;;  %v691_v20 = vadd.f32 %v690_v5, %v689_v53 }
  0x71   : > { %v653_v49 = vadd.f32 %v652_v14, %v651_v0  ;;  %v660_v48 = vadd.f32 %v659_v62, %v658_v8  ;;  %v673_v34 = vrot.slane %v672_v15, 1  ;;  %v697_v63 = vrot.slane %v696_v47, 4 }
  0x72   : > { %v667_v61 = vadd.f32 %v666_v38, %v665_v12  ;;  %v680_v52 = vrot.slane %v679_v44, 1  ;;  %v685_v6 = vrot.slane %v684_v46, 2  ;;  %v692_v24 = vrot.slane %v691_v20, 2 }
  0x73   : > { %v719_v2 = vsel %vm615_vm1, %v660_v48, %v653_v49  ;;  %v1619_v9 = vmul.f32 %v1235_v31, %v1318_v29  ;;  %v735_v45 = vsel %vm542_vm0, %v1511_v39, 0.0  ;;  %v674_v59 = vadd.f32 %v673_v34, %v672_v15 }
  0x74   : > { %v681_v32 = vadd.f32 %v680_v52, %v679_v44  ;;  %v686_v25 = vadd.f32 %v685_v6, %v684_v46  ;;  %v698_v4 = vadd.f32 %v697_v63, %v696_v47  ;;  %v693_v42 = vadd.f32 %v692_v24, %v691_v20 }
  0x75   : > { %v720_v37 = vsel %vm617_vm2, %v667_v61, %v719_v2  ;;  %v736_v57 = vrot.slane %v735_v45, 4  ;;  %v742_v26 = vsel %vm542_vm0, %v1515_v13, 0.0  ;;  %v749_v22 = vsel %vm542_vm0, %v1519_v56, 0.0 }
  0x76   : > { %v687_v53 = vrot.slane %v686_v25, 1  ;;  %v699_v54 = vrot.slane %v698_v4, 2  ;;  %v721_v51 = vsel %vm619_vm3, %v674_v59, %v720_v37  ;;  %v743_v11 = vrot.slane %v742_v26, 4 }
  0x77   : > { %v1112_v7 = vpop.eup %1111  ;;  %v694_v39 = vrot.slane %v693_v42, 1  ;;  %v722_v50 = vsel %vm621_vm4, %v681_v32, %v721_v51  ;;  %v737_v0 = vadd.f32 %v736_v57, %v735_v45  ;;  %v750_v52 = vrot.slane %v749_v22, 4 }
  0x78   : > { %v1114_v55 = vpop.eup %1113  ;;  %v368_v23 = vmul.f32 %v1112_v7, %v359_v16  ;;  %v688_v12 = vadd.f32 %v687_v53, %v686_v25  ;;  %v700_v58 = vadd.f32 %v699_v54, %v698_v4  ;;  %v744_v17 = vadd.f32 %v743_v11, %v742_v26 }
  0x79   : > { %v470_v8 = vmul.f32 0.6931472, %v1114_v55  ;;  %v695_v14 = vadd.f32 %v694_v39, %v693_v42  ;;  %v738_v62 = vrot.slane %v737_v0, 2  ;;  %v751_v45 = vadd.f32 %v750_v52, %v749_v22  ;;  %v541_v52 = vld [vmem:[#allocation2 + $0x8] sm:$0x1] }
  0x7a   : > { %v494_v1 = vadd.f32 1.0, %v368_v23  ;;  %v1629_v13 = vmul.f32 %v368_v23, %v1235_v31  ;;  %v701_v5 = vrot.slane %v700_v58, 1  ;;  %v723_v16 = vsel %vm623_vm5, %v688_v12, %v722_v50 }
  0x7b   : > { %v476_v38 = vsel %vm1611_vm9, %v473_v28, %v470_v8  ;;  %v745_v15 = vrot.slane %v744_v17, 2  ;;  %v724_v47 = vsel %vm625_vm6, %v695_v14, %v723_v16  ;;  %v739_v61 = vadd.f32 %v738_v62, %v737_v0  ;;  %v637_v62 = vld [vmem:[#allocation2 + $0x18] sm:$0x1] }
  0x7c   : > { %v485_v44 = vadd.f32 %v476_v38, %v1589_v19  ;;  %v503_v46 = vadd.f32 %v494_v1, %v1318_v29  ;;  %v646_v49 = vmul.f32 %v1619_v9, %v1629_v13  ;;  %v702_v48 = vadd.f32 %v701_v5, %v700_v58 }
  0x7d   : > { %v746_v20 = vadd.f32 %v745_v15, %v744_v17  ;;  %v756_v19 = vsel %vm542_vm0, %v1525_v27, 0.0  ;;  %v740_v63 = vrot.slane %v739_v61, 1  ;;  %v752_v42 = vrot.slane %v751_v45, 2 }
  0x7e   : > { %v512_v28 = vmul.f32 %v485_v44, %v1235_v31  ;;  %v703_v34 = vsel %vm542_vm0, %v646_v49, 0.0  ;;  %v725_v29 = vsel %vm627_vm7, %v702_v48, %v724_v47  ;;  %v757_v59 = vrot.slane %v756_v19, 4 }
  0x7f   : > { %v704_v6 = vrot.slane %v703_v34, 4  ;;  %v747_v24 = vrot.slane %v746_v20, 1  ;;  %v741_v25 = vadd.f32 %v740_v63, %v739_v61  ;;  %v763_v31 = vsel %vm542_vm0, %v1529_v40, 0.0  ;;  %921 = vst [vmem:[%s1565_s30 + $0x10] sm:$0xff] %v725_v29 }
  0x80   : > { %v521_v2 = vmul.f32 %v512_v28, %v503_v46  ;;  %v758_v37 = vadd.f32 %v757_v59, %v756_v19  ;;  %v764_v27 = vrot.slane %v763_v31, 4  ;;  %v770_v7 = vsel %vm542_vm0, %v1533_v36, 0.0 }
  0x81   : > { %v705_v32 = vadd.f32 %v704_v6, %v703_v34  ;;  %v748_v56 = vadd.f32 %v747_v24, %v746_v20  ;;  %v777_v53 = vsel %vm542_vm0, %v1539_v33, 0.0  ;;  %v753_v54 = vadd.f32 %v752_v42, %v751_v45 }
  0x82   : > { %v599_v4 = vsel %vm542_vm0, %v521_v2, 0.0  ;;  %v759_v51 = vrot.slane %v758_v37, 2  ;;  %v765_v11 = vadd.f32 %v764_v27, %v763_v31  ;;  %v771_v55 = vrot.slane %v770_v7, 4 }
  0x83   : > { %v600_v57 = vrot.slane %v599_v4, 4  ;;  %v706_v26 = vrot.slane %v705_v32, 2  ;;  %v778_v39 = vrot.slane %v777_v53, 4  ;;  %v784_v50 = vsel %vm542_vm0, %v1543_v3, 0.0 }
  0x84   : > { %v754_v0 = vrot.slane %v753_v54, 1  ;;  %v760_v8 = vadd.f32 %v759_v51, %v758_v37  ;;  %v766_v12 = vrot.slane %v765_v11, 2  ;;  %v772_v58 = vadd.f32 %v771_v55, %v770_v7 }
  0x85   : > { %v601_v23 = vadd.f32 %v600_v57, %v599_v4  ;;  %v707_v40 = vadd.f32 %v706_v26, %v705_v32  ;;  %v779_v36 = vadd.f32 %v778_v39, %v777_v53  ;;  %v785_v14 = vrot.slane %v784_v50, 4 }
  0x86   : > { %v755_v33 = vadd.f32 %v754_v0, %v753_v54  ;;  %v761_v38 = vrot.slane %v760_v8, 1  ;;  %v767_v5 = vadd.f32 %v766_v12, %v765_v11  ;;  %v773_v16 = vrot.slane %v772_v58, 2 }
  0x87   : > { %v602_v17 = vrot.slane %v601_v23, 2  ;;  %v708_v1 = vrot.slane %v707_v40, 1  ;;  %v780_v46 = vrot.slane %v779_v36, 2  ;;  %v786_v47 = vadd.f32 %v785_v14, %v784_v50 }
  0x88   : > { %v762_v49 = vadd.f32 %v761_v38, %v760_v8  ;;  %v768_v48 = vrot.slane %v767_v5, 1  ;;  %v774_v3 = vadd.f32 %v773_v16, %v772_v58  ;;  %v807_v61 = vsel %vm615_vm1, %v748_v56, %v741_v25  ;;  %v734_v38 = vld [vmem:[#allocation2 + $0x28] sm:$0x1] }
  0x89   : > { %v603_v15 = vadd.f32 %v602_v17, %v601_v23  ;;  %v709_v44 = vadd.f32 %v708_v1, %v707_v40  ;;  %v781_v28 = vadd.f32 %v780_v46, %v779_v36  ;;  %v787_v34 = vrot.slane %v786_v47, 2 }
  0x8a   : > { %v769_v19 = vadd.f32 %v768_v48, %v767_v5  ;;  %v775_v29 = vrot.slane %v774_v3, 1  ;;  %v808_v6 = vsel %vm617_vm2, %v755_v33, %v807_v61  ;;  %v791_v63 = vsel %vm542_vm0, %v1629_v13, 0.0 }
  0x8b   : > { %v604_v20 = vrot.slane %v603_v15, 1  ;;  %v729_v22 = vadd.f32 %v709_v44, %v637_v62  ;;  %v782_v2 = vrot.slane %v781_v28, 1  ;;  %v788_v45 = vadd.f32 %v787_v34, %v786_v47 }
  0x8c   : > { %v809_v59 = vsel %vm619_vm3, %v762_v49, %v808_v6  ;;  %v776_v32 = vadd.f32 %v775_v29, %v774_v3  ;;  %v792_v56 = vrot.slane %v791_v63, 4  ;;  %v823_v31 = vsel %vm542_vm0, %v1547_v60, 0.0 }
  0x8d   : > { %v605_v24 = vadd.f32 %v604_v20, %v603_v15  ;;  %731 = vst [vmem:[#allocation2 + $0x18] sm:$0x1] %v729_v22  ;;  %v810_v25 = vsel %vm621_vm4, %v769_v19, %v809_v59  ;;  %v783_v42 = vadd.f32 %v782_v2, %v781_v28  ;;  %v789_v37 = vrot.slane %v788_v45, 1 }
  0x8e   : > { %v824_v27 = vrot.slane %v823_v31, 4  ;;  %v811_v57 = vsel %vm623_vm5, %v776_v32, %v810_v25  ;;  %v793_v13 = vadd.f32 %v792_v56, %v791_v63  ;;  %v830_v26 = vsel %vm542_vm0, %v1552_v30, 0.0 }
  0x8f   : > { %v632_v4 = vadd.f32 %v605_v24, %v541_v52  ;;  %v837_v7 = vsel %vm542_vm0, %v1556_v21, 0.0  ;;  %v790_v53 = vadd.f32 %v789_v37, %v788_v45  ;;  %v812_v54 = vsel %vm625_vm6, %v783_v42, %v811_v57 }
  0x90   : > { %v825_v51 = vadd.f32 %v824_v27, %v823_v31  ;;  %v831_v11 = vrot.slane %v830_v26, 4  ;;  %v794_v60 = vrot.slane %v793_v13, 2  ;;  %v838_v55 = vrot.slane %v837_v7, 4 }
  0x91   : > { %634 = vst [vmem:[#allocation2 + $0x8] sm:$0x1] %v632_v4  ;;  %v844_v23 = vsel %vm542_vm0, %v1560_v10, 0.0  ;;  %v851_v40 = vsel %vm542_vm0, %v1569_v35, 0.0  ;;  %v813_v30 = vsel %vm627_vm7, %v790_v53, %v812_v54  ;;  %v858_v14 = vsel %vm542_vm0, %v1573_v18, 0.0 }
  0x92   : > { %v826_v39 = vrot.slane %v825_v51, 2  ;;  %v832_v21 = vadd.f32 %v831_v11, %v830_v26  ;;  %v845_v50 = vrot.slane %v844_v23, 4  ;;  %v795_v0 = vadd.f32 %v794_v60, %v793_v13  ;;  %923 = vst [vmem:[%s1565_s30 + $0x20] sm:$0xff] %v813_v30 }
  0x93   : > { %v839_v8 = vadd.f32 %v838_v55, %v837_v7  ;;  %v852_v12 = vrot.slane %v851_v40, 4  ;;  %v859_v33 = vrot.slane %v858_v14, 4  ;;  %v865_v44 = vsel %vm542_vm0, %v1577_v41, 0.0 }
  0x94   : > { %v914_v58 = vld [vmem:[#allocation2 + $0x18] sm:$0x1]  ;;  %v827_v17 = vadd.f32 %v826_v39, %v825_v51  ;;  %v833_v1 = vrot.slane %v832_v21, 2  ;;  %v846_v36 = vadd.f32 %v845_v50, %v844_v23  ;;  %v796_v10 = vrot.slane %v795_v0, 1 }
  0x95   : > { %922 = vst [vmem:[%s1565_s30 + $0x18] sm:$0x1] %v914_v58  ;;  %v840_v62 = vrot.slane %v839_v8, 2  ;;  %v853_v35 = vadd.f32 %v852_v12, %v851_v40  ;;  %v860_v48 = vadd.f32 %v859_v33, %v858_v14  ;;  %v866_v22 = vrot.slane %v865_v44, 4 }
  0x96   : > { %v828_v5 = vrot.slane %v827_v17, 1  ;;  %v834_v16 = vadd.f32 %v833_v1, %v832_v21  ;;  %v847_v15 = vrot.slane %v846_v36, 2  ;;  %v797_v46 = vadd.f32 %v796_v10, %v795_v0 }
  0x97   : > { %v841_v47 = vadd.f32 %v840_v62, %v839_v8  ;;  %v854_v49 = vrot.slane %v853_v35, 2  ;;  %v861_v19 = vrot.slane %v860_v48, 2  ;;  %v867_v63 = vadd.f32 %v866_v22, %v865_v44  ;;  %v822_v8 = vld [vmem:[#allocation2 + $0x38] sm:$0x1] }
  0x98   : > { %v912_v3 = vld [vmem:[#allocation2 + $0x8] sm:$0x1]  ;;  %v829_v18 = vadd.f32 %v828_v5, %v827_v17  ;;  %v835_v61 = vrot.slane %v834_v16, 1  ;;  %v848_v20 = vadd.f32 %v847_v15, %v846_v36  ;;  %v817_v28 = vadd.f32 %v797_v46, %v734_v38 }
  0x99   : > { %920 = vst [vmem:[%s1565_s30 + $0x8] sm:$0x1] %v912_v3  ;;  %v842_v34 = vrot.slane %v841_v47, 1  ;;  %v855_v52 = vadd.f32 %v854_v49, %v853_v35  ;;  %v872_v41 = vsel %vm542_vm0, %v1581_v43, 0.0  ;;  %v862_v45 = vadd.f32 %v861_v19, %v860_v48 }
  0x9a   : > { %v836_v29 = vadd.f32 %v835_v61, %v834_v16  ;;  %v849_v6 = vrot.slane %v848_v20, 1  ;;  %819 = vst [vmem:[#allocation2 + $0x28] sm:$0x1] %v817_v28  ;;  %v873_v59 = vrot.slane %v872_v41, 4  ;;  %v868_v25 = vrot.slane %v867_v63, 2 }
  0x9b   : > { %v843_v24 = vadd.f32 %v842_v34, %v841_v47  ;;  %v856_v2 = vrot.slane %v855_v52, 1  ;;  %v879_v31 = vsel %vm542_vm0, %v1619_v9, 0.0  ;;  %v863_v42 = vrot.slane %v862_v45, 1 }
  0x9c   : > { %v850_v32 = vadd.f32 %v849_v6, %v848_v20  ;;  %v895_v56 = vsel %vm615_vm1, %v836_v29, %v829_v18  ;;  %v874_v37 = vadd.f32 %v873_v59, %v872_v41  ;;  %v869_v57 = vadd.f32 %v868_v25, %v867_v63 }
  0x9d   : > { %v857_v4 = vadd.f32 %v856_v2, %v855_v52  ;;  %v896_v27 = vsel %vm617_vm2, %v843_v24, %v895_v56  ;;  %v880_v13 = vrot.slane %v879_v31, 4  ;;  %v864_v26 = vadd.f32 %v863_v42, %v862_v45 }
  0x9e   : > { %v897_v43 = vsel %vm619_vm3, %v850_v32, %v896_v27  ;;  %v875_v7 = vrot.slane %v874_v37, 2  ;;  %v870_v54 = vrot.slane %v869_v57, 1 }
  0x9f   : > { %v898_v53 = vsel %vm621_vm4, %v857_v4, %v897_v43  ;;  %v881_v51 = vadd.f32 %v880_v13, %v879_v31 }
  0xa0   : > { %v876_v11 = vadd.f32 %v875_v7, %v874_v37  ;;  %v899_v9 = vsel %vm623_vm5, %v864_v26, %v898_v53  ;;  %v871_v60 = vadd.f32 %v870_v54, %v869_v57 }
  0xa1   : > { %v882_v55 = vrot.slane %v881_v51, 2  ;;  %v916_v23 = vld [vmem:[#allocation2 + $0x28] sm:$0x1] }
  0xa2   : > { %v877_v40 = vrot.slane %v876_v11, 1  ;;  %924 = vst [vmem:[%s1565_s30 + $0x28] sm:$0x1] %v916_v23  ;;  %v900_v30 = vsel %vm625_vm6, %v871_v60, %v899_v9 }
  0xa3   : > { %v883_v39 = vadd.f32 %v882_v55, %v881_v51 }
  0xa4   : > { %v878_v21 = vadd.f32 %v877_v40, %v876_v11 }
  0xa5   : > { %v884_v50 = vrot.slane %v883_v39, 1 }
  0xa6   : > { %v901_v0 = vsel %vm627_vm7, %v878_v21, %v900_v30 }
  0xa7   : > { %v885_v12 = vadd.f32 %v884_v50, %v883_v39  ;;  %925 = vst [vmem:[%s1565_s30 + $0x30] sm:$0xff] %v901_v0 }
  0xa9   : > { %v905_v58 = vadd.f32 %v885_v12, %v822_v8 }
  0xab   : > { %907 = vst [vmem:[#allocation2 + $0x38] sm:$0x1] %v905_v58 }
  0xb2   : > { %v918_v17 = vld [vmem:[#allocation2 + $0x38] sm:$0x1] }
  0xb3   : > { %926 = vst [vmem:[%s1565_s30 + $0x38] sm:$0x1] %v918_v17 }
  0xb4 PF: > { %s13_s14 = sadd.s32 1, %s1137_s14   ;;  %s1731_s12 = smov %s1133_s13 }
  0xb5   : > { %p10_p5 = scmp.ge.s32.totalorder %s13_s14, 4   ;;  %s1732_s13 = smov %s1734_s15 }
  0xb7   :  { %12 = sbr.rel (!%p10_p5) target bundleno = 2 (0x2), region = 79 }

</bundles_post_ra>
